<compile_context>
chip_gen: v6e
topology: v6e:2x2x1
jax: 0.10.0
libtpu: 0.0.40
codegen_flags: <defaults>
</compile_context>

<pallas_src>
import functools

import jax
import jax.numpy as jnp
from jax import lax
from jax.experimental import pallas as pl
from jax.experimental.pallas import tpu as pltpu


# ------------------------------ small helpers (plain JAX) ------------------------------

def _simple_rmsnorm(v, dim):
    # zeta SimpleRMSNorm: F.normalize(x, dim=-1) * dim**0.5
    ssq = jnp.sum(v * v, axis=-1, keepdims=True)
    inv = lax.rsqrt(jnp.maximum(ssq, 1e-24))
    return v * (inv * (float(dim) ** 0.5))


def _softplus(v):
    # PyTorch F.softplus (beta=1, threshold=20)
    return jnp.where(v > 20.0, v, jnp.log1p(jnp.exp(jnp.minimum(v, 20.0))))


def _weight_quant(w):
    # BitNet weight_quant: sign(w - mean(w)) * mean(|w|)  (over the whole matrix)
    return jnp.sign(w - jnp.mean(w)) * jnp.mean(jnp.abs(w))


def _round_up(a, b):
    return (a + b - 1) // b * b


# --------------------------------- Pallas expert kernel ---------------------------------

def _expert_kernel(te_ref, act_ref, x_ref, g_ref, w1_ref, w2_ref, o_ref, *, hidden):
    """One routed-token tile through its expert: FC1 -> ReLU -> quant -> FC2 -> scale."""
    t = pl.program_id(0)

    @pl.when(act_ref[t] == 0)
    def _padding_tile():
        o_ref[...] = jnp.zeros_like(o_ref)

    @pl.when(act_ref[t] != 0)
    def _active_tile():
        qx = x_ref[...]                                                  # (TILE, DP) bf16, integer valued
        # BitLinear #1 with {-1,0,+1} sign weights (scalar weight scale cancels downstream
        # because SimpleRMSNorm/activation_quant are invariant to positive per-row scaling).
        h = jnp.dot(qx, w1_ref[0], preferred_element_type=jnp.float32)   # (TILE, HP) f32
        h = jnp.maximum(h, 0.0)                                          # ReLU (padded cols stay 0)

        # BitLinear #2 input transform: SimpleRMSNorm + activation_quant, deferred dequant.
        ssq = jnp.sum(h * h, axis=-1, keepdims=True)                     # (TILE, 1)
        inv = lax.rsqrt(jnp.maximum(ssq, 1e-24)) * (float(hidden) ** 0.5)
        amax = jnp.maximum(jnp.max(h, axis=-1, keepdims=True) * inv, 1e-5)   # max|rmsnorm(h)|
        qh = jnp.clip(jnp.round(h * (inv * (127.0 / amax))), -128.0, 127.0)  # integer valued

        o = jnp.dot(qh.astype(jnp.bfloat16), w2_ref[0],
                    preferred_element_type=jnp.float32)                  # (TILE, DP) f32
        # g already folds gate * mean(|w2_e|); amax/127 is the deferred activation dequant.
        o_ref[...] = (g_ref[...] * (amax * (1.0 / 127.0))) * o


# --------------------------------------- wrapper ---------------------------------------

@functools.partial(jax.jit, static_argnames=("top_k",))
def bitmoe_forward(x, noise, wr, wn, w1, w2, top_k=2):
    """x: (B,S,D); noise: (B,S,E); wr,wn: (E,D); w1: (E,4D,D); w2: (E,D,4D)."""
    B, S, D = x.shape
    E = wr.shape[0]
    H = w1.shape[1]
    k = top_k
    T = B * S
    A = T * k                                        # routed (token, expert) assignments

    DP = _round_up(D, 128)                           # lane-dense feature dims
    HP = _round_up(H, 128)

    # ---- routed-token tile: multiple of 8, >= 2 routed tiles, VMEM-bounded ----
    def _step_bytes(tile):
        blocks = 2 * (tile * DP * 2 + tile * 4 + DP * HP * 2 + HP * DP * 2 + tile * DP * 4)
        return blocks + 3 * tile * HP * 4
    TILE = 512
    while TILE > 8 and 2 * TILE > max(8, A):
        TILE //= 2
    while TILE > 8 and _step_bytes(TILE) > 40 * 2 ** 20:
        TILE //= 2
    R_TILES = -(-A // TILE) + E                      # static upper bound on routed tiles
    R_PAD = R_TILES * TILE

    # ================= plain-JAX prologue (tiny vs. expert FLOPs) =================
    x2 = x.reshape(T, D).astype(jnp.float32)
    xn = _simple_rmsnorm(x2, D)
    s_x = jnp.maximum(jnp.max(jnp.abs(xn), axis=-1, keepdims=True), 1e-5)
    q_x = jnp.clip(jnp.round(xn * (127.0 / s_x)), -128.0, 127.0)     # integer valued f32
    xq = q_x * (s_x * (1.0 / 127.0))                                 # dequantized BitLinear input

    # Router (f32 end-to-end so top-k selection is exact).
    logits = xq @ _weight_quant(wr.astype(jnp.float32)).T            # (T, E)
    noise_logits = xq @ _weight_quant(wn.astype(jnp.float32)).T      # (T, E)
    noisy = logits + noise.reshape(T, E).astype(jnp.float32) * _softplus(noise_logits)
    top_vals, top_idx = lax.top_k(noisy, k)                          # (T, k)
    gates = jax.nn.softmax(top_vals, axis=-1)                        # sparse softmax over top-k

    # Expert weights: exact {-1,0,+1} sign patterns (lossless in bf16); FC2 scale folded into gate.
    w1f = w1.astype(jnp.float32)
    w2f = w2.astype(jnp.float32)
    w1_sign = jnp.sign(w1f - jnp.mean(w1f, axis=(1, 2), keepdims=True))      # (E, H, D)
    w2_sign = jnp.sign(w2f - jnp.mean(w2f, axis=(1, 2), keepdims=True))      # (E, D, H)
    w2_scale = jnp.mean(jnp.abs(w2f), axis=(1, 2))                           # (E,)

    w1_k = jnp.zeros((E, DP, HP), jnp.bfloat16).at[:, :D, :H].set(
        jnp.swapaxes(w1_sign, 1, 2).astype(jnp.bfloat16))
    w2_k = jnp.zeros((E, HP, DP), jnp.bfloat16).at[:, :H, :D].set(
        jnp.swapaxes(w2_sign, 1, 2).astype(jnp.bfloat16))

    # ---- routed (grouped-by-expert) token layout ----
    expert_a = top_idx.reshape(-1).astype(jnp.int32)                 # (A,)
    token_a = jnp.repeat(jnp.arange(T, dtype=jnp.int32), k)          # (A,)
    gate_a = gates.reshape(-1) * w2_scale[expert_a]                  # gate * FC2 weight scale

    order = jnp.argsort(expert_a)                                    # stable sort by expert
    e_s, t_s, g_s = expert_a[order], token_a[order], gate_a[order]

    counts = jnp.bincount(expert_a, length=E)                        # (E,)
    tiles_per_e = (counts + TILE - 1) // TILE
    cum_tiles = jnp.cumsum(tiles_per_e)
    row_start = (cum_tiles - tiles_per_e) * TILE                     # padded row start per expert
    assign_start = jnp.cumsum(counts) - counts

    dest = row_start[e_s] + (jnp.arange(A, dtype=jnp.int32) - assign_start[e_s])

    src_token = jnp.full((R_PAD,), T, jnp.int32).at[dest].set(t_s)   # sentinel T = dropped row
    row_gate = jnp.zeros((R_PAD, 1), jnp.float32).at[dest, 0].set(g_s)

    qx_pad = jnp.zeros((T + 1, DP), jnp.float32).at[:T, :D].set(q_x)
    routed_x = jnp.take(qx_pad, src_token, axis=0).astype(jnp.bfloat16)   # (R_PAD, DP)

    used_tiles = cum_tiles[-1]
    tile_ids = jnp.arange(R_TILES, dtype=jnp.int32)
    te_raw = jnp.minimum(jnp.searchsorted(cum_tiles, tile_ids, side="right"),
                         E - 1).astype(jnp.int32)
    te_last = te_raw[jnp.clip(used_tiles - 1, 0, R_TILES - 1)]
    tile_active = (tile_ids < used_tiles).astype(jnp.int32)
    # trailing (inactive) tiles keep the last active expert index -> no extra weight DMA
    tile_expert = jnp.where(tile_active == 1, te_raw, te_last).astype(jnp.int32)

    # ---- advisory cost estimate (routed traffic; weights ~once per expert group) ----
    flops = 4 * R_PAD * DP * HP
    bytes_accessed = (R_PAD * DP * 2 + R_PAD * 4 + R_PAD * DP * 4
                      + 2 * E * (DP * HP + HP * DP))
    vmem_limit = int(min(56 * 2 ** 20, max(16 * 2 ** 20, 2 * _step_bytes(TILE))))

    kernel = functools.partial(_expert_kernel, hidden=H)

    routed_out = pl.pallas_call(
        kernel,
        out_shape=jax.ShapeDtypeStruct((R_PAD, DP), jnp.float32),
        grid_spec=pltpu.PrefetchScalarGridSpec(
            num_scalar_prefetch=2,
            grid=(R_TILES,),
            in_specs=[
                pl.BlockSpec((TILE, DP), lambda t, te, act: (t, 0)),          # routed q_x
                pl.BlockSpec((TILE, 1), lambda t, te, act: (t, 0)),           # per-row gate
                pl.BlockSpec((1, DP, HP), lambda t, te, act: (te[t], 0, 0)),  # expert fc1 (sign)
                pl.BlockSpec((1, HP, DP), lambda t, te, act: (te[t], 0, 0)),  # expert fc2 (sign)
            ],
            out_specs=pl.BlockSpec((TILE, DP), lambda t, te, act: (t, 0)),
        ),
        compiler_params=pltpu.CompilerParams(
            dimension_semantics=("parallel",),
            vmem_limit_bytes=vmem_limit),
        cost_estimate=pl.CostEstimate(
            flops=flops, transcendentals=2 * R_PAD, bytes_accessed=bytes_accessed),
    )(tile_expert, tile_active, routed_x, row_gate, w1_k, w2_k)

    # Scatter-add routed expert outputs back to tokens (padding rows land on the dropped row).
    out = jnp.zeros((T + 1, DP), jnp.float32).at[src_token].add(routed_out)
    return out[:T, :D].reshape(B, S, D).astype(x.dtype)


if __name__ == "__main__":
    key = jax.random.PRNGKey(0)
    B, S, D, E, K = 2, 8, 32, 4, 2
    H = 4 * D

    ks = jax.random.split(key, 6)
    x = jax.random.normal(ks[0], (B, S, D), jnp.float32)
    noise = jax.random.normal(ks[1], (B, S, E), jnp.float32)   # stands in for torch.randn_like

    def linear_init(k_, shape, fan_in):
        bound = 1.0 / (fan_in ** 0.5)
        return jax.random.uniform(k_, shape, jnp.float32, -bound, bound)

    # PyTorch-style (out_features, in_features) weights, deterministic init.
    wr = linear_init(ks[2], (E, D), D)       # router topkroute_linear
    wn = linear_init(ks[3], (E, D), D)       # router noise_linear
    w1 = linear_init(ks[4], (E, H, D), D)    # per-expert BitLinear(dim, 4*dim)
    w2 = linear_init(ks[5], (E, D, H), H)    # per-expert BitLinear(4*dim, dim)

    out = bitmoe_forward(x, noise, wr, wn, w1, w2, top_k=K)
    jax.block_until_ready(out)
    assert out.shape == (B, S, D)
    print("KERNEL_OK")
</pallas_src>

<mosaic_0001>
module attributes {stable_mosaic.version = 11 : i64} {
  func.func private @main(%arg0: i32) attributes {dimension_semantics = [#tpu.dimension_semantics<core_parallel>], iteration_bounds = array<i64: 2>, tpu.core_type = #tpu.core_type<sc_scalar_subcore>, window_params = []} {
    return
  }
}

module attributes {stable_mosaic.version = 11 : i64} {
  func.func private @main(%arg0: i32) attributes {dimension_semantics = [#tpu.dimension_semantics<core_parallel>], iteration_bounds = array<i64: 2>, tpu.core_type = #tpu.core_type<sc_scalar_subcore>, window_params = []} {
    return
  }
}

module attributes {stable_mosaic.version = 11 : i64} {
  func.func @_expert_kernel(%arg0: i32, %arg1: memref<6xi32, #tpu.memory_space<smem>>, %arg2: memref<6xi32, #tpu.memory_space<smem>>, %arg3: memref<16x128xbf16, #tpu.memory_space<vmem>>, %arg4: memref<16x1xf32, #tpu.memory_space<vmem>>, %arg5: memref<1x128x128xbf16, #tpu.memory_space<vmem>>, %arg6: memref<1x128x128xbf16, #tpu.memory_space<vmem>>, %arg7: memref<16x128xf32, #tpu.memory_space<vmem>>) attributes {dimension_semantics = [#tpu.dimension_semantics<parallel>], iteration_bounds = array<i64: 6>, scalar_prefetch = 2 : i64, scratch_operands = 0 : i64, tpu.core_type = #tpu.core_type<tc>, window_params = [{transform_indices = @transform_0, window_bounds = array<i64: 16, 128>}, {transform_indices = @transform_1, window_bounds = array<i64: 16, 1>}, {transform_indices = @transform_2, window_bounds = array<i64: 1, 128, 128>}, {transform_indices = @transform_3, window_bounds = array<i64: 1, 128, 128>}, {transform_indices = @transform_4, window_bounds = array<i64: 16, 128>}]} {
    %0 = arith.index_cast %arg0 : i32 to index
    %1 = memref.load %arg2[%0] : memref<6xi32, #tpu.memory_space<smem>>
    %c0_i32 = arith.constant 0 : i32
    %2 = arith.cmpi eq, %1, %c0_i32 : i32
    %3 = arith.extui %2 : i1 to i32
    %c0_i32_0 = arith.constant 0 : i32
    %4 = arith.cmpi ne, %3, %c0_i32_0 : i32
    scf.if %4 {
      %cst = arith.constant 0.000000e+00 : f32
      %10 = vector.broadcast %cst : f32 to vector<16x128xf32>
      %c0 = arith.constant 0 : index
      %c0_3 = arith.constant 0 : index
      %11 = vector.load %arg7[%c0, %c0_3] : memref<16x128xf32, #tpu.memory_space<vmem>>, vector<16x128xf32>
      tpu.vector_store %arg7[%c0, %c0_3], %10 {strides = array<i32>} : memref<16x128xf32, #tpu.memory_space<vmem>>, vector<16x128xf32>,
    } else {
    }
    %5 = arith.index_cast %arg0 : i32 to index
    %6 = memref.load %arg2[%5] : memref<6xi32, #tpu.memory_space<smem>>
    %c0_i32_1 = arith.constant 0 : i32
    %7 = arith.cmpi ne, %6, %c0_i32_1 : i32
    %8 = arith.extui %7 : i1 to i32
    %c0_i32_2 = arith.constant 0 : i32
    %9 = arith.cmpi ne, %8, %c0_i32_2 : i32
    scf.if %9 {
      %c0 = arith.constant 0 : index
      %c0_3 = arith.constant 0 : index
      %10 = vector.load %arg3[%c0, %c0_3] : memref<16x128xbf16, #tpu.memory_space<vmem>>, vector<16x128xbf16>
      %c0_4 = arith.constant 0 : index
      %c0_5 = arith.constant 0 : index
      %c0_6 = arith.constant 0 : index
      %11 = vector.load %arg5[%c0_4, %c0_5, %c0_6] : memref<1x128x128xbf16, #tpu.memory_space<vmem>>, vector<1x128x128xbf16>
      %12 = vector.shape_cast %11 : vector<1x128x128xbf16> to vector<128x128xbf16>
      %cst = arith.constant dense<0.000000e+00> : vector<16x128xf32>
      %13 = tpu.matmul %10, %12, %cst {dimension_numbers = #tpu.dot_dimension_numbers<[1], [0], [0], [1], [0, 0, 1, 1], [], []>} : vector<16x128xbf16>, vector<128x128xbf16>, vector<16x128xf32> -> vector<16x128xf32>
      %cst_7 = arith.constant 0.000000e+00 : f32
      %14 = vector.broadcast %cst_7 : f32 to vector<16x128xf32>
      %15 = arith.maximumf %13, %14 : vector<16x128xf32>
      %16 = arith.mulf %15, %15 : vector<16x128xf32>
      %cst_8 = arith.constant dense<0.000000e+00> : vector<16xf32>
      %17 = vector.multi_reduction <add>, %16, %cst_8 [1] : vector<16x128xf32> to vector<16xf32>
      %18 = vector.shape_cast %17 : vector<16xf32> to vector<16x1xf32>
      %cst_9 = arith.constant 1.000000e-24 : f32
      %19 = vector.broadcast %cst_9 : f32 to vector<16x1xf32>
      %20 = arith.maximumf %18, %19 : vector<16x1xf32>
      %21 = math.rsqrt %20 : vector<16x1xf32>
      %cst_10 = arith.constant 11.3137083 : f32
      %22 = vector.broadcast %cst_10 : f32 to vector<16x1xf32>
      %23 = arith.mulf %21, %22 : vector<16x1xf32>
      %cst_11 = arith.constant dense<0xFF800000> : vector<16xf32>
      %24 = vector.multi_reduction <maximumf>, %15, %cst_11 [1] : vector<16x128xf32> to vector<16xf32>
      %25 = vector.shape_cast %24 : vector<16xf32> to vector<16x1xf32>
      %26 = arith.mulf %25, %23 : vector<16x1xf32>
      %cst_12 = arith.constant 9.99999974E-6 : f32
      %27 = vector.broadcast %cst_12 : f32 to vector<16x1xf32>
      %28 = arith.maximumf %26, %27 : vector<16x1xf32>
      %cst_13 = arith.constant 1.270000e+02 : f32
      %29 = vector.broadcast %cst_13 : f32 to vector<16x1xf32>
      %30 = arith.divf %29, %28 : vector<16x1xf32>
      %31 = arith.mulf %23, %30 : vector<16x1xf32>
      %32 = vector.broadcast %31 : vector<16x1xf32> to vector<16x128xf32>
      %33 = arith.mulf %15, %32 : vector<16x128xf32>
      %34 = math.roundeven %33 : vector<16x128xf32>
      %cst_14 = arith.constant -1.280000e+02 : f32
      %cst_15 = arith.constant 1.270000e+02 : f32
      %35 = vector.broadcast %cst_14 : f32 to vector<16x128xf32>
      %36 = arith.maximumf %35, %34 : vector<16x128xf32>
      %37 = vector.broadcast %cst_15 : f32 to vector<16x128xf32>
      %38 = arith.minimumf %37, %36 : vector<16x128xf32>
      %39 = arith.truncf %38 : vector<16x128xf32> to vector<16x128xbf16>
      %c0_16 = arith.constant 0 : index
      %c0_17 = arith.constant 0 : index
      %c0_18 = arith.constant 0 : index
      %40 = vector.load %arg6[%c0_16, %c0_17, %c0_18] : memref<1x128x128xbf16, #tpu.memory_space<vmem>>, vector<1x128x128xbf16>
      %41 = vector.shape_cast %40 : vector<1x128x128xbf16> to vector<128x128xbf16>
      %cst_19 = arith.constant dense<0.000000e+00> : vector<16x128xf32>
      %42 = tpu.matmul %39, %41, %cst_19 {dimension_numbers = #tpu.dot_dimension_numbers<[1], [0], [0], [1], [0, 0, 1, 1], [], []>} : vector<16x128xbf16>, vector<128x128xbf16>, vector<16x128xf32> -> vector<16x128xf32>
      %c0_20 = arith.constant 0 : index
      %c0_21 = arith.constant 0 : index
      %43 = vector.load %arg4[%c0_20, %c0_21] : memref<16x1xf32, #tpu.memory_space<vmem>>, vector<16x1xf32>
      %cst_22 = arith.constant 0.00787401571 : f32
      %44 = vector.broadcast %cst_22 : f32 to vector<16x1xf32>
      %45 = arith.mulf %28, %44 : vector<16x1xf32>
      %46 = arith.mulf %43, %45 : vector<16x1xf32>
      %47 = vector.broadcast %46 : vector<16x1xf32> to vector<16x128xf32>
      %48 = arith.mulf %47, %42 : vector<16x128xf32>
      %c0_23 = arith.constant 0 : index
      %c0_24 = arith.constant 0 : index
      %49 = vector.load %arg7[%c0_23, %c0_24] : memref<16x128xf32, #tpu.memory_space<vmem>>, vector<16x128xf32>
      tpu.vector_store %arg7[%c0_23, %c0_24], %48 {strides = array<i32>} : memref<16x128xf32, #tpu.memory_space<vmem>>, vector<16x128xf32>,
    } else {
    }
    return
  }
  func.func @transform_0(%arg0: i32, %arg1: memref<6xi32, #tpu.memory_space<smem>>, %arg2: memref<6xi32, #tpu.memory_space<smem>>) -> (i32, i32) {
    %c0_i32 = arith.constant 0 : i32
    %c0_i32_0 = arith.constant 0 : i32
    return %arg0, %c0_i32 : i32, i32
  }
  func.func @transform_1(%arg0: i32, %arg1: memref<6xi32, #tpu.memory_space<smem>>, %arg2: memref<6xi32, #tpu.memory_space<smem>>) -> (i32, i32) {
    %c0_i32 = arith.constant 0 : i32
    %c0_i32_0 = arith.constant 0 : i32
    return %arg0, %c0_i32 : i32, i32
  }
  func.func @transform_2(%arg0: i32, %arg1: memref<6xi32, #tpu.memory_space<smem>>, %arg2: memref<6xi32, #tpu.memory_space<smem>>) -> (i32, i32, i32) {
    %0 = arith.index_cast %arg0 : i32 to index
    %1 = memref.load %arg1[%0] : memref<6xi32, #tpu.memory_space<smem>>
    %c0_i32 = arith.constant 0 : i32
    %c0_i32_0 = arith.constant 0 : i32
    %c0_i32_1 = arith.constant 0 : i32
    return %1, %c0_i32, %c0_i32_0 : i32, i32, i32
  }
  func.func @transform_3(%arg0: i32, %arg1: memref<6xi32, #tpu.memory_space<smem>>, %arg2: memref<6xi32, #tpu.memory_space<smem>>) -> (i32, i32, i32) {
    %0 = arith.index_cast %arg0 : i32 to index
    %1 = memref.load %arg1[%0] : memref<6xi32, #tpu.memory_space<smem>>
    %c0_i32 = arith.constant 0 : i32
    %c0_i32_0 = arith.constant 0 : i32
    %c0_i32_1 = arith.constant 0 : i32
    return %1, %c0_i32, %c0_i32_0 : i32, i32, i32
  }
  func.func @transform_4(%arg0: i32, %arg1: memref<6xi32, #tpu.memory_space<smem>>, %arg2: memref<6xi32, #tpu.memory_space<smem>>) -> (i32, i32) {
    %c0_i32 = arith.constant 0 : i32
    %c0_i32_0 = arith.constant 0 : i32
    return %arg0, %c0_i32 : i32, i32
  }
}

</mosaic_0001>

<bundles_post_ra>
// kernel: custom-call
= control target key start
LH: loop header
LB: loop body
LE: loop exit
PB: predicated region body
PF: predicated region fallthrough
CT: control target
= control target key end

     0   :  { %s6_s0 = inlined_call_operand.vmem [shape: u32[6], index: 0, kind: output, shape index: {}]  }

// kernel: bitmoe_forward.1
= control target key start
LH: loop header
LB: loop body
LE: loop exit
PB: predicated region body
PF: predicated region fallthrough
CT: control target
= control target key end

     0   :  { %s992_s0 = inlined_call_operand.vmem [shape: s32[6], index: 0, kind: input, shape index: {}]   ;;  %s993_s2 = inlined_call_operand.vmem [shape: bf16[96,128], index: 2, kind: input, shape index: {}]   ;;  %s994_s3 = inlined_call_operand.vmem [shape: f32[96,1], index: 3, kind: input, shape index: {}]   ;;  %s995_s4 = inlined_call_operand.vmem [shape: bf16[4,128,128], index: 4, kind: input, shape index: {}]   ;;  %s996_s5 = inlined_call_operand.vmem [shape: bf16[4,128,128], index: 5, kind: input, shape index: {}]   ;;  %s997_s6 = inlined_call_operand.vmem [shape: f32[96,128], index: 6, kind: output, shape index: {}]   ;;  %s998_s1 = inlined_call_operand.vmem [shape: s32[6], index: 1, kind: input, shape index: {}]  }
   0x1   :  { %s11_s23 = sshll.u32 %s992_s0, 4  ;;  %s15_s26 = sshll.u32 %s998_s1, 4  ;;  %s12_s23 = int_to_ptr.vmem [resolvable:$true] %s11_s23  ;;  %s16_s26 = int_to_ptr.vmem [resolvable:$true] %s15_s26 }
   0x2   :  { %s822_s27 = scalar_lea.vmem %s12_s23, 16  ;;  %p827_p1 = scmp.lt.s32.totalorder %s12_s23, %s12_s23 }
   0x3   :  { %p823_p0 = scmp.ne.s32.totalorder %s12_s23, %s822_s27  ;;  %p828_p2 = scmp.lt.s32.totalorder %s822_s27, %s822_s27 }
   0x5   :  { %p829_p3 = por %p828_p2, %p827_p1 }
   0x7   :  { %p830_p4 = pnand %p829_p3, %p823_p0 }
   0x9   :  { %833 = shalt.err (!%p830_p4)  }
   0xa   :  { %s856_s28 = smov [#allocation3]   ;;  %s834_s29 = scalar_lea.vmem %s16_s26, 16 }
   0xb   :  { %14 = dma.vmem_to_smem %s12_s23, 16, %s856_s28, [#allocation2] }
   0xc   :  { %p835_p5 = scmp.ne.s32.totalorder %s16_s26, %s834_s29  ;;  %p839_p6 = scmp.lt.s32.totalorder %s16_s26, %s16_s26 }
   0xd   :  { %p840_p7 = scmp.lt.s32.totalorder %s834_s29, %s834_s29 }
   0xf   :  { %p841_p8 = por %p840_p7, %p839_p6 }
  0x11   :  { %p842_p9 = pnand %p841_p8, %p835_p5 }
  0x13   :  { %845 = shalt.err (!%p842_p9)  }
  0x14   :  { %s857_s0 = smov [#allocation4]  }
  0x15   :  { %18 = dma.vmem_to_smem %s16_s26, 16, %s857_s0, [#allocation2] }
  0x16   :  { %850 = dma.done.wait [#allocation2], 32 }
  0x17   :  { %851 = vsyncadd [#allocation2], 4294967264 }
  0x18   :  { %20 = sfence }
  0x19   :  { %s903_s1 = smov 0  }
  0x1a LB: > { %s669_s30 = sadd.s32 4294967295, %s854_s1   ;;  %p673_p10 = scmp.ge.s32.totalorder %s854_s1, 1  ;;  %s854_s1 = sphi %s903_s1, %s26_s1  }
  0x1b   : > { %p214_p11 = scmp.lt.s32.totalorder %s854_s1, 7 }
  0x1d   : > { %p215_p12 = pnand %p673_p10, %p214_p11 }
  0x1e   : > { %s674_s7 = sshll.u32 (!%p215_p12), %s669_s30, 1  ;;  %s269_s8 = sld [smem:[#allocation3 + %s669_s30]] (!%p215_p12) }
  0x1f   : > { %218 = sbr.rel (%p215_p12) target bundleno = 692 (0x2b4), region = 36  ;;  %p258_p13 = scmp.lt.s32.totalorder (!%p215_p12), %s674_s7, 11 }
  0x20   : > { %s276_s9 = sld [smem:[#allocation3 + %s669_s30]] (!%p215_p12) }
  0x21   : > { %s290_s10 = sld [smem:[#allocation4 + %s669_s30]] (!%p215_p12) }
  0x24   : > { %s1000_s7 = smov (!%p258_p13, %s674_s7), 11  ;;  %p270_p0 = scmp.lt.s32.totalorder %s269_s8, 3 }
  0x25   : > { %s675_s11 = sshll.u32 %s1000_s7, 2  ;;  %s677_s12 = sshll.u32 %s1000_s7, 3 }
  0x26   : > { %s914_s15 = scalar_lea.vmem %s993_s2, %s675_s11  ;;  %s919_s18 = scalar_lea.vmem %s994_s3, %s677_s12 }
  0x27   : > { %p277_p1 = scmp.lt.s32.totalorder %s276_s9, 3  ;;  %s924_s21 = scalar_lea.vmem %s997_s6, %s677_s12 }
  0x28   : > { %s1002_s8 = smov (!%p270_p0, %s269_s8), 3  ;;  %p684_p2 = scmp.ne.s32.totalorder %s290_s10, 0 }
  0x29   : > { %s1004_s9 = smov (!%p277_p1, %s276_s9), 3  ;;  %s705_s22 = sshll.u32 %s1002_s8, 6 }
  0x2a   : > { %s929_s25 = scalar_lea.vmem %s995_s4, %s705_s22  ;;  %s706_s26 = sshll.u32 %s1004_s9, 6 }
  0x2b   : > { %s934_s29 = scalar_lea.vmem %s996_s5, %s706_s26  ;;  %294 = sbr.rel (%p684_p2) target bundleno = 50 (0x32), region = 40 }
  0x30   : > { %v858_v0 = vmov 0.0  }
  0x31   : > { %295 = vst [vmem:[%s924_s21] sm:$0xff] %v858_v0  ;;  %296 = vst [vmem:[%s924_s21 + $0x8] sm:$0xff] %v858_v0 }
  0x32 PF: > { %s297_s0 = sld [smem:[#allocation4 + %s669_s30]] }
  0x38   : > { %p685_p3 = scmp.eq.s32.totalorder %s297_s0, 0 }
  0x3a   : > { %301 = sbr.rel (%p685_p3) target bundleno = 692 (0x2b4), region = 44 }
  0x3f   : > { %v797_v1 = vld [vmem:[%s929_s25 + $0x38] sm:$0xff]   ;;  %v859_v2 = vmov 0.0   ;;  %v798_v3 = vld [vmem:[%s929_s25 + $0x30] sm:$0xff]   ;;  %vm860_vm0 = vmmov 0   ;;  %v799_v4 = vld [vmem:[%s929_s25 + $0x28] sm:$0xff]   ;;  %v861_v19 = vmov 0  }
  0x40   : > { %725 = vmatprep.subr.bf16.mxu0 %v859_v2  ;;  %745 = vmatprep.subr.bf16.mxu1 %v859_v2  ;;  %v800_v5 = vld [vmem:[%s929_s25 + $0x20] sm:$0xff]   ;;  %v801_v6 = vld [vmem:[%s929_s25 + $0x18] sm:$0xff]   ;;  %v802_v7 = vld [vmem:[%s929_s25 + $0x10] sm:$0xff]  }
  0x41   : > { %726 = vmatpush3.bf16.msra.mxu0 %v797_v1  ;;  %741 = vmatprep.mubr.msk.bf16.mxu0 %vm860_vm0, %v859_v2  ;;  %v803_v8 = vld [vmem:[%s929_s25 + $0x8] sm:$0xff]   ;;  %v804_v9 = vld [vmem:[%s929_s25] sm:$0xff]   ;;  %v806_v20 = vld [vmem:[%s934_s29 + $0x38] sm:$0xff]  }
  0x42   : > { %727 = vmatprep.subr.bf16.mxu0 %v859_v2  ;;  %761 = vmatprep.mubr.msk.bf16.mxu1 %vm860_vm0, %v859_v2  ;;  %v805_v10 = vld [vmem:[%s914_s15] sm:$0xff]   ;;  %v807_v21 = vld [vmem:[%s934_s29 + $0x30] sm:$0xff]   ;;  %v808_v22 = vld [vmem:[%s934_s29 + $0x28] sm:$0xff]  }
  0x43   : > { %795 = vset.pattern.permute.xlu0 %v861_v19  ;;  %796 = vset.pattern.permute.xlu1 %v861_v19  ;;  %v809_v23 = vld [vmem:[%s934_s29 + $0x20] sm:$0xff]   ;;  %v810_v24 = vld [vmem:[%s934_s29 + $0x18] sm:$0xff]   ;;  %v811_v25 = vld [vmem:[%s934_s29 + $0x10] sm:$0xff]  }
  0x44   : > { %746 = vmatpush3.bf16.msra.mxu1 %v806_v20  ;;  %v812_v26 = vld [vmem:[%s934_s29 + $0x8] sm:$0xff]   ;;  %v813_v27 = vld [vmem:[%s934_s29] sm:$0xff]  }
  0x45   : > { %728 = vmatpush3.bf16.msra.mxu0 %v798_v3  ;;  %747 = vmatprep.subr.bf16.mxu1 %v859_v2  ;;  %v557_v40 = vld [vmem:[%s919_s18] sm:$0xff]  ;;  %v558_v45 = vld [vmem:[%s919_s18 + $0x8] sm:$0xff] }
  0x46   : > { %729 = vmatprep.subr.bf16.mxu0 %v859_v2 }
  0x48   : > { %748 = vmatpush3.bf16.msra.mxu1 %v807_v21 }
  0x49   : > { %730 = vmatpush3.bf16.msra.mxu0 %v799_v4  ;;  %749 = vmatprep.subr.bf16.mxu1 %v859_v2 }
  0x4a   : > { %731 = vmatprep.subr.bf16.mxu0 %v859_v2 }
  0x4c   : > { %750 = vmatpush3.bf16.msra.mxu1 %v808_v22 }
  0x4d   : > { %732 = vmatpush3.bf16.msra.mxu0 %v800_v5  ;;  %751 = vmatprep.subr.bf16.mxu1 %v859_v2 }
  0x4e   : > { %733 = vmatprep.subr.bf16.mxu0 %v859_v2 }
  0x50   : > { %752 = vmatpush3.bf16.msra.mxu1 %v809_v23 }
  0x51   : > { %734 = vmatpush3.bf16.msra.mxu0 %v801_v6  ;;  %753 = vmatprep.subr.bf16.mxu1 %v859_v2 }
  0x52   : > { %735 = vmatprep.subr.bf16.mxu0 %v859_v2 }
  0x54   : > { %754 = vmatpush3.bf16.msra.mxu1 %v810_v24 }
  0x55   : > { %736 = vmatpush3.bf16.msra.mxu0 %v802_v7  ;;  %755 = vmatprep.subr.bf16.mxu1 %v859_v2 }
  0x56   : > { %737 = vmatprep.subr.bf16.mxu0 %v859_v2 }
  0x58   : > { %756 = vmatpush3.bf16.msra.mxu1 %v811_v25 }
  0x59   : > { %738 = vmatpush3.bf16.msra.mxu0 %v803_v8  ;;  %757 = vmatprep.subr.bf16.mxu1 %v859_v2 }
  0x5a   : > { %739 = vmatprep.subr.bf16.mxu0 %v859_v2 }
  0x5c   : > { %758 = vmatpush3.bf16.msra.mxu1 %v812_v26 }
  0x5d   : > { %740 = vmatpush3.bf16.msra.mxu0 %v804_v9  ;;  %759 = vmatprep.subr.bf16.mxu1 %v859_v2 }
  0x60   : > { %742 = vmatmul.mubr.bf16.vlgmr.msra.gmra.mxu0 %v805_v10  ;;  %760 = vmatpush3.bf16.msra.mxu1 %v813_v27 }
 0x120   : > { %v408_v11 = vpop.f32.mrf.mxu0 }
 0x121   : > { %v958_v12 = vmax.f32 %v408_v11, 0.0 }
 0x122   : > { %v743_v13 = vpop.f32.mrf.mxu0 }
 0x123   : > { %429 = vmax.xlane.f32.xlu1 %v958_v12  ;;  %v417_v14 = vmul.f32 %v958_v12, %v958_v12 }
 0x124   : > { %v411_v15 = vpop.f32.mrf.mxu0 }
 0x125   : > { %v963_v16 = vmax.f32 %v411_v15, 0.0  ;;  %419 = vadd.xlane.f32.xlu0 %v417_v14 }
 0x126   : > { %v744_v17 = vpop.f32.mrf.mxu0 }
 0x127   : > { %431 = vmax.xlane.f32.xlu1 %v963_v16  ;;  %v418_v18 = vmul.f32 %v963_v16, %v963_v16 }
 0x129   : > { %421 = vadd.xlane.f32.xlu0 %v418_v18 }
 0x1ac   : > { %v430_v33 = vpop.xlane.xlu1 %429 }
 0x1ae   : > { %v420_v28 = vpop.xlane.xlu0 %419 }
 0x1af   : > { %v423_v29 = vmax.f32 %v420_v28, 1e-24 }
 0x1b0   : > { %v432_v39 = vpop.xlane.xlu1 %431 }
 0x1b1   : > { %814 = vrsqrt.f32 %v423_v29 }
 0x1b2   : > { %v422_v30 = vpop.xlane.xlu0 %421 }
 0x1b3   : > { %v424_v31 = vmax.f32 %v422_v30, 1e-24 }
 0x1b5   : > { %816 = vrsqrt.f32 %v424_v31 }
 0x1be   : > { %v815_v32 = vpop.eup %814 }
 0x1bf   : > { %v427_v34 = vmul.f32 11.313708, %v815_v32 }
 0x1c1   : > { %v433_v35 = vmul.f32 %v430_v33, %v427_v34 }
 0x1c2   : > { %v817_v36 = vpop.eup %816 }
 0x1c3   : > { %v435_v37 = vmax.f32 %v433_v35, 1e-05  ;;  %v428_v38 = vmul.f32 11.313708, %v817_v36 }
 0x1c5   : > { %818 = vrcp.f32 %v435_v37  ;;  %v434_v41 = vmul.f32 %v432_v39, %v428_v38  ;;  %v559_v42 = vmul.f32 0.007874016, %v435_v37 }
 0x1c7   : > { %v436_v43 = vmax.f32 %v434_v41, 1e-05  ;;  %v561_v44 = vmul.f32 %v559_v42, %v557_v40 }
 0x1c9   : > { %820 = vrcp.f32 %v436_v43  ;;  %565 = vperm.xlu0 %795, %v561_v44   ;;  %v560_v46 = vmul.f32 0.007874016, %v436_v43 }
 0x1cb   : > { %v562_v47 = vmul.f32 %v560_v46, %v558_v45 }
 0x1cd   : > { %570 = vperm.xlu1 %796, %v562_v47  }
 0x1d2   : > { %v819_v48 = vpop.eup %818 }
 0x1d3   : > { %v438_v49 = vmul.f32 127.0, %v819_v48 }
 0x1d5   : > { %v441_v50 = vmul.f32 %v438_v49, %v427_v34 }
 0x1d6   : > { %v821_v51 = vpop.eup %820 }
 0x1d7   : > { %v443_v52 = vmul.f32 %v441_v50, %v958_v12  ;;  %v440_v53 = vmul.f32 127.0, %v821_v51 }
 0x1d9   : > { %v442_v54 = vmul.f32 %v440_v53, %v428_v38  ;;  %v767_v55 = vcvt.f32.s32 %v443_v52  ;;  %v765_v58 = vand.u32 2147483647, %v443_v52  ;;  %v770_v60 = vand.u32 2147483648, %v443_v52 }
 0x1db   : > { %v444_v56 = vmul.f32 %v442_v54, %v963_v16  ;;  %v768_v57 = vcvt.s32.f32 %v767_v55  ;;  %vm766_vm1 = vcmp.lt.f32.partialorder %v765_v58, 8388608.0 }
 0x1dd   : > { %v769_v59 = vand.u32 2147483647, %v768_v57  ;;  %v775_v61 = vcvt.f32.s32 %v444_v56  ;;  %v773_v0 = vand.u32 2147483647, %v444_v56  ;;  %v778_v3 = vand.u32 2147483648, %v444_v56 }
 0x1df   : > { %v771_v62 = vor.u32 %v770_v60, %v769_v59  ;;  %v776_v63 = vcvt.s32.f32 %v775_v61  ;;  %vm774_vm2 = vcmp.lt.f32.partialorder %v773_v0, 8388608.0 }
 0x1e1   : > { %v772_v1 = vsel %vm766_vm1, %v771_v62, %v443_v52  ;;  %v777_v2 = vand.u32 2147483647, %v776_v63 }
 0x1e2   : > { %v447_v5 = vmax.f32 %v772_v1, -128.0 }
 0x1e3   : > { %v779_v4 = vor.u32 %v778_v3, %v777_v2 }
 0x1e4   : > { %v449_v8 = vmin.f32 %v447_v5, 127.0 }
 0x1e5   : > { %v780_v6 = vsel %vm774_vm2, %v779_v4, %v444_v56 }
 0x1e6   : > { %v448_v7 = vmax.f32 %v780_v6, -128.0 }
 0x1e8   : > { %v450_v9 = vmin.f32 %v448_v7, 127.0 }
 0x1ea   : > { %v451_v10 = vpack.c.bf16 %v450_v9, %v449_v8 }
 0x1ec   : > { %762 = vmatmul.mubr.bf16.vlgmr.msra.gmra.mxu1 %v451_v10 }
 0x244   : > { %v566_v11 = vpop.permute.xlu0 %565 }
 0x248   : > { %v571_v15 = vpop.permute.xlu1 %570 }
 0x2ac   : > { %v550_v12 = vpop.f32.mrf.mxu1 }
 0x2ad   : > { %v573_v13 = vmul.f32 %v566_v11, %v550_v12 }
 0x2ae   : > { %v763_v14 = vpop.f32.mrf.mxu1 }
 0x2af   : > { %575 = vst [vmem:[%s924_s21] sm:$0xff] %v573_v13 }
 0x2b0   : > { %v553_v16 = vpop.f32.mrf.mxu1 }
 0x2b1   : > { %v574_v17 = vmul.f32 %v571_v15, %v553_v16 }
 0x2b2   : > { %v764_v18 = vpop.f32.mrf.mxu1 }
 0x2b3   : > { %576 = vst [vmem:[%s924_s21 + $0x8] sm:$0xff] %v574_v17 }
 0x2b4 PF: > { %s26_s1 = sadd.s32 1, %s854_s1  }
 0x2b5   : > { %p23_p4 = scmp.ge.s32.totalorder %s26_s1, 8  }
 0x2b7   :  { %25 = sbr.rel (!%p23_p4) target bundleno = 26 (0x1a), region = 83 }

</bundles_post_ra>
